<compile_context>
chip_gen: v7x
topology: tpu7x:2x2x1
jax: 0.10.0
libtpu: 0.0.40
codegen_flags: <defaults>
</compile_context>

<pallas_src>
import jax
import jax.numpy as jnp
from jax.experimental import pallas as pl
from jax.experimental.pallas import tpu as pltpu

BN_EPS = 1e-5


def _round_up(x, m):
    return (x + m - 1) // m * m


def _rw_embed_kernel(probe_ref, gallery_ref, w_ref, b_ref, out_ref):
    p = probe_ref[...]                 # (TILE_P, F)  f32
    g = gallery_ref[...]               # (Ng, F)      f32
    tile_p, feat = p.shape
    ng = g.shape[0]

    # Pairwise squared differences, flattened onto the matmul M axis.
    d = p[:, None, :] - g[None, :, :]                     # (TILE_P, Ng, F)
    d2 = (d * d).reshape(tile_p * ng, feat)               # (M, F); Ng % 8 == 0

    # BatchNorm is pre-folded into w/b; Dropout is identity in eval mode.
    lhs = d2.astype(w_ref.dtype)                          # bf16 cast at the MXU
    out = jnp.dot(lhs, w_ref[...], preferred_element_type=jnp.float32)
    out_ref[...] = (out + b_ref[...]).astype(out_ref.dtype)


def random_walk_embed(probe_x, gallery_x, gamma, beta, running_mean,
                      running_var, weight_t, bias, *, use_bf16=True,
                      target_m=256):
    """probe_x: [Np, F], gallery_x: [Ng, F], weight_t: [F, C], bias: [C]."""
    n_probe, feat = probe_x.shape
    n_gallery, _ = gallery_x.shape
    num_classes = weight_t.shape[1]
    out_dtype = probe_x.dtype

    # ---- fold eval-mode BN + classifier bias into the weight (one-time O(F*C)).
    scale = gamma * jax.lax.rsqrt(running_var + BN_EPS)            # (F,)
    w_fold = weight_t * scale[:, None]                             # (F, C)
    b_fold = (beta - running_mean * scale) @ weight_t + bias       # (C,)

    # ---- layout padding: lane-dense class axis, sublane-aligned gallery axis.
    c_pad = _round_up(num_classes, 128)
    ng_pad = _round_up(n_gallery, 8)
    if c_pad != num_classes:
        w_fold = jnp.pad(w_fold, ((0, 0), (0, c_pad - num_classes)))
        b_fold = jnp.pad(b_fold, (0, c_pad - num_classes))
    if ng_pad != n_gallery:
        gallery_x = jnp.pad(gallery_x, ((0, ng_pad - n_gallery), (0, 0)))

    # ---- probe batching so the matmul M = tile_p * ng_pad fills the MXU.
    tile_p = max(1, -(-target_m // ng_pad))        # ceil(target_m / ng_pad)
    tile_p = _round_up(min(tile_p, n_probe), 8)    # keep (8,128) alignment
    np_pad = _round_up(n_probe, tile_p)
    if np_pad != n_probe:
        probe_x = jnp.pad(probe_x, ((0, np_pad - n_probe), (0, 0)))

    mm_dtype = jnp.bfloat16 if use_bf16 else probe_x.dtype
    w_fold = w_fold.astype(mm_dtype)
    b_fold = b_fold.reshape(1, c_pad).astype(jnp.float32)

    m_block = tile_p * ng_pad
    grid = (np_pad // tile_p,)

    const2d = lambda shape: pl.BlockSpec(shape, lambda i: (0, 0))

    out_flat = pl.pallas_call(
        _rw_embed_kernel,
        out_shape=jax.ShapeDtypeStruct((np_pad * ng_pad, c_pad), out_dtype),
        grid_spec=pltpu.PrefetchScalarGridSpec(
            num_scalar_prefetch=0,
            grid=grid,
            in_specs=[
                pl.BlockSpec((tile_p, feat), lambda i: (i, 0)),   # probe tile
                const2d((ng_pad, feat)),                          # gallery
                const2d((feat, c_pad)),                           # folded weight
                const2d((1, c_pad)),                              # folded bias
            ],
            out_specs=pl.BlockSpec((m_block, c_pad), lambda i: (i, 0)),
        ),
        compiler_params=pltpu.CompilerParams(
            dimension_semantics=("parallel",)),
    )(probe_x, gallery_x, w_fold, b_fold)

    out = out_flat.reshape(np_pad, ng_pad, c_pad)
    return out[:n_probe, :n_gallery, :num_classes]


def _reference(probe_x, gallery_x, gamma, beta, mean, var, weight_t, bias):
    d2 = (probe_x[:, None, :] - gallery_x[None, :, :]) ** 2
    d2 = d2.reshape(-1, probe_x.shape[1])
    bn = (d2 - mean) / jnp.sqrt(var + BN_EPS) * gamma + beta
    out = bn @ weight_t + bias
    return out.reshape(probe_x.shape[0], gallery_x.shape[0], -1)


if __name__ == "__main__":
    # Small shapes consistent with the module's forward.
    N_PROBE = 8
    N_GALLERY = 8
    FEAT_NUM = 256
    NUM_CLASSES = 128

    key = jax.random.PRNGKey(0)
    k_probe, k_gallery, k_w = jax.random.split(key, 3)

    probe_x = jax.random.normal(k_probe, (N_PROBE, FEAT_NUM), jnp.float32)
    gallery_x = jax.random.normal(k_gallery, (N_GALLERY, FEAT_NUM), jnp.float32)

    # Deterministic parameter init per module __init__:
    gamma = jnp.ones((FEAT_NUM,), jnp.float32)           # bn.weight.fill_(1)
    beta = jnp.zeros((FEAT_NUM,), jnp.float32)           # bn.bias.zero_()
    running_mean = jnp.zeros((FEAT_NUM,), jnp.float32)   # default running stats
    running_var = jnp.ones((FEAT_NUM,), jnp.float32)
    # classifier.weight ~ N(0, 0.001), stored transposed as [F, C]
    weight_t = 0.001 * jax.random.normal(k_w, (FEAT_NUM, NUM_CLASSES), jnp.float32)
    bias = jnp.zeros((NUM_CLASSES,), jnp.float32)        # classifier.bias.zero_()

    args = (probe_x, gallery_x, gamma, beta, running_mean, running_var,
            weight_t, bias)

    out_bf16 = jax.block_until_ready(random_walk_embed(*args, use_bf16=True))
    out_f32 = jax.block_until_ready(random_walk_embed(*args, use_bf16=False))
    ref = _reference(*args)

    assert out_bf16.shape == (N_PROBE, N_GALLERY, NUM_CLASSES)
    assert out_f32.shape == (N_PROBE, N_GALLERY, NUM_CLASSES)
    # Strict check for the f32 path (only BN-fold rounding differs).
    assert jnp.allclose(out_f32, ref, atol=1e-4, rtol=1e-4), "f32 mismatch"
    # bf16 MXU operands (f32 accumulation) -> bf16-appropriate tolerance.
    assert jnp.allclose(out_bf16, ref, atol=5e-3, rtol=5e-2), "bf16 mismatch"

    print("KERNEL_OK")
</pallas_src>

<mosaic_0001>
module attributes {stable_mosaic.version = 11 : i64} {
  func.func @_rw_embed_kernel(%arg0: i32, %arg1: memref<8x256xf32, #tpu.memory_space<vmem>>, %arg2: memref<8x256xf32, #tpu.memory_space<vmem>>, %arg3: memref<256x128xbf16, #tpu.memory_space<vmem>>, %arg4: memref<1x128xf32, #tpu.memory_space<vmem>>, %arg5: memref<64x128xf32, #tpu.memory_space<vmem>>) attributes {dimension_semantics = [#tpu.dimension_semantics<parallel>], iteration_bounds = array<i64: 1>, scalar_prefetch = 0 : i64, scratch_operands = 0 : i64, tpu.core_type = #tpu.core_type<tc>, window_params = [{transform_indices = @transform_0, window_bounds = array<i64: 8, 256>}, {pipeline_mode = #tpu.pipeline_mode<synchronous>, transform_indices = @transform_1, window_bounds = array<i64: 8, 256>}, {pipeline_mode = #tpu.pipeline_mode<synchronous>, transform_indices = @transform_2, window_bounds = array<i64: 256, 128>}, {pipeline_mode = #tpu.pipeline_mode<synchronous>, transform_indices = @transform_3, window_bounds = array<i64: 1, 128>}, {transform_indices = @transform_4, window_bounds = array<i64: 64, 128>}]} {
    %c0 = arith.constant 0 : index
    %c0_0 = arith.constant 0 : index
    %0 = vector.load %arg1[%c0, %c0_0] : memref<8x256xf32, #tpu.memory_space<vmem>>, vector<8x256xf32>
    %c0_1 = arith.constant 0 : index
    %c0_2 = arith.constant 0 : index
    %1 = vector.load %arg2[%c0_1, %c0_2] : memref<8x256xf32, #tpu.memory_space<vmem>>, vector<8x256xf32>
    %2 = vector.shape_cast %0 : vector<8x256xf32> to vector<8x1x256xf32>
    %3 = vector.shape_cast %1 : vector<8x256xf32> to vector<1x8x256xf32>
    %4 = vector.broadcast %2 : vector<8x1x256xf32> to vector<8x8x256xf32>
    %5 = vector.broadcast %3 : vector<1x8x256xf32> to vector<8x8x256xf32>
    %6 = arith.subf %4, %5 : vector<8x8x256xf32>
    %7 = arith.mulf %6, %6 : vector<8x8x256xf32>
    %8 = vector.shape_cast %7 : vector<8x8x256xf32> to vector<64x256xf32>
    %9 = arith.truncf %8 : vector<64x256xf32> to vector<64x256xbf16>
    %c0_3 = arith.constant 0 : index
    %c0_4 = arith.constant 0 : index
    %10 = vector.load %arg3[%c0_3, %c0_4] : memref<256x128xbf16, #tpu.memory_space<vmem>>, vector<256x128xbf16>
    %cst = arith.constant dense<0.000000e+00> : vector<64x128xf32>
    %11 = tpu.matmul %9, %10, %cst {dimension_numbers = #tpu.dot_dimension_numbers<[1], [0], [0], [1], [0, 0, 1, 1], [], []>} : vector<64x256xbf16>, vector<256x128xbf16>, vector<64x128xf32> -> vector<64x128xf32>
    %c0_5 = arith.constant 0 : index
    %c0_6 = arith.constant 0 : index
    %12 = vector.load %arg4[%c0_5, %c0_6] : memref<1x128xf32, #tpu.memory_space<vmem>>, vector<1x128xf32>
    %13 = vector.broadcast %12 : vector<1x128xf32> to vector<64x128xf32>
    %14 = arith.addf %11, %13 : vector<64x128xf32>
    %c0_7 = arith.constant 0 : index
    %c0_8 = arith.constant 0 : index
    %15 = vector.load %arg5[%c0_7, %c0_8] : memref<64x128xf32, #tpu.memory_space<vmem>>, vector<64x128xf32>
    tpu.vector_store %arg5[%c0_7, %c0_8], %14 {strides = array<i32>} : memref<64x128xf32, #tpu.memory_space<vmem>>, vector<64x128xf32>,
    return
  }
  func.func @transform_0(%arg0: i32) -> (i32, i32) {
    %c0_i32 = arith.constant 0 : i32
    %c0_i32_0 = arith.constant 0 : i32
    return %arg0, %c0_i32 : i32, i32
  }
  func.func @transform_1(%arg0: i32) -> (i32, i32) {
    %c0_i32 = arith.constant 0 : i32
    %c0_i32_0 = arith.constant 0 : i32
    %c0_i32_1 = arith.constant 0 : i32
    return %c0_i32, %c0_i32_0 : i32, i32
  }
  func.func @transform_2(%arg0: i32) -> (i32, i32) {
    %c0_i32 = arith.constant 0 : i32
    %c0_i32_0 = arith.constant 0 : i32
    %c0_i32_1 = arith.constant 0 : i32
    return %c0_i32, %c0_i32_0 : i32, i32
  }
  func.func @transform_3(%arg0: i32) -> (i32, i32) {
    %c0_i32 = arith.constant 0 : i32
    %c0_i32_0 = arith.constant 0 : i32
    %c0_i32_1 = arith.constant 0 : i32
    return %c0_i32, %c0_i32_0 : i32, i32
  }
  func.func @transform_4(%arg0: i32) -> (i32, i32) {
    %c0_i32 = arith.constant 0 : i32
    %c0_i32_0 = arith.constant 0 : i32
    return %arg0, %c0_i32 : i32, i32
  }
}

</mosaic_0001>

<bundles_post_ra>
// kernel: tpu_custom_call.1
= control target key start
LH: loop header
LB: loop body
LE: loop exit
PB: predicated region body
PF: predicated region fallthrough
CT: control target
= control target key end

     0   :  { %9 = vsyncpa [#allocation3], 0  ;;  %s778_s0 = inlined_call_operand.hbm [shape: f32[8,256], index: 0, kind: input, shape index: {}]   ;;  %s779_s1 = inlined_call_operand.hbm [shape: f32[8,256], index: 1, kind: input, shape index: {}]   ;;  %s780_s2 = inlined_call_operand.hbm [shape: bf16[256,128], index: 2, kind: input, shape index: {}]   ;;  %s781_s3 = inlined_call_operand.vmem [shape: f32[1,128], index: 3, kind: input, shape index: {}]   ;;  %s782_s4 = inlined_call_operand.hbm [shape: f32[64,128], index: 4, kind: output, shape index: {}]  }
   0x1   :  { %10 = vsyncpa [#allocation6], 0 }
   0x2   :  { %11 = vsyncpa [#allocation4], 0  ;;  %s653_s15 = smov [#allocation5]   ;;  %s654_s17 = smov [#allocation2]  }
   0x3   :  { %s28_s16 = sshll.u32 %s653_s15, 4  ;;  %s18_s18 = sshll.u32 %s654_s17, 4  ;;  %s29_s16 = int_to_ptr.vmem [resolvable:$true] %s28_s16  ;;  %s19_s18 = int_to_ptr.vmem [resolvable:$true] %s18_s18 }
   0x4   :  { %s559_s21 = scalar_lea.hbm %s779_s1, 256 }
   0x5   :  { %p560_p0 = scmp.ne.s32.totalorder %s779_s1, %s559_s21  ;;  %p563_p1 = scmp.lt.u32.totalorder %s559_s21, %s779_s1 }
   0x7   :  { %p565_p2 = pnand %p563_p1, %p560_p0 }
   0x9   :  { %568 = shalt.err (!%p565_p2)
}
   0xa   :  { %s569_s26 = scalar_lea.vmem %s29_s16, 256  ;;  %p574_p4 = scmp.lt.s32.totalorder %s29_s16, %s29_s16 }
   0xb   :  { %p570_p3 = scmp.ne.s32.totalorder %s29_s16, %s569_s26  ;;  %p575_p5 = scmp.lt.s32.totalorder %s569_s26, %s569_s26 }
   0xd   :  { %p576_p6 = por %p575_p5, %p574_p4 }
   0xf   :  { %p577_p7 = pnand %p576_p6, %p570_p3 }
  0x11   :  { %580 = shalt.err (!%p577_p7)
}
  0x12   :  { %31 = dma.hbm_to_vmem [thread:$0]  %s779_s1, 256, %s29_s16, [#allocation6]  }
  0x13   :  { %s581_s5 = scalar_lea.hbm %s778_s0, 256 }
  0x14   :  { %p582_p8 = scmp.ne.s32.totalorder %s778_s0, %s581_s5  ;;  %p585_p9 = scmp.lt.u32.totalorder %s581_s5, %s778_s0 }
  0x16   :  { %p587_p10 = pnand %p585_p9, %p582_p8 }
  0x18   :  { %590 = shalt.err (!%p587_p10)
}
  0x19   :  { %s591_s10 = scalar_lea.vmem %s19_s18, 256  ;;  %p596_p12 = scmp.lt.s32.totalorder %s19_s18, %s19_s18 }
  0x1a   :  { %p592_p11 = scmp.ne.s32.totalorder %s19_s18, %s591_s10  ;;  %p597_p13 = scmp.lt.s32.totalorder %s591_s10, %s591_s10 }
  0x1c   :  { %p598_p0 = por %p597_p13, %p596_p12 }
  0x1e   :  { %p599_p1 = pnand %p598_p0, %p592_p11 }
  0x20   :  { %602 = shalt.err (!%p599_p1)
}
  0x21   :  { %21 = dma.hbm_to_vmem [thread:$0]  %s778_s0, 256, %s19_s18, [#allocation3]  }
  0x22   :  { %s655_s12 = smov [#allocation7]   ;;  %s603_s16 = scalar_lea.hbm %s780_s2, 2048 }
  0x23   :  { %s37_s13 = sshll.u32 %s655_s12, 4  ;;  %p604_p2 = scmp.ne.s32.totalorder %s780_s2, %s603_s16  ;;  %s38_s13 = int_to_ptr.vmem [resolvable:$true] %s37_s13 }
  0x24   :  { %p607_p3 = scmp.lt.u32.totalorder %s603_s16, %s780_s2 }
  0x26   :  { %p609_p4 = pnand %p607_p3, %p604_p2 }
  0x28   :  { %612 = shalt.err (!%p609_p4)
}
  0x29   :  { %s613_s22 = scalar_lea.vmem %s38_s13, 2048  ;;  %p618_p6 = scmp.lt.s32.totalorder %s38_s13, %s38_s13 }
  0x2a   :  { %p614_p5 = scmp.ne.s32.totalorder %s38_s13, %s613_s22  ;;  %p619_p7 = scmp.lt.s32.totalorder %s613_s22, %s613_s22 }
  0x2c   :  { %p620_p8 = por %p619_p7, %p618_p6 }
  0x2e   :  { %p621_p9 = pnand %p620_p8, %p614_p5 }
  0x30   :  { %624 = shalt.err (!%p621_p9)
}
  0x31   :  { %s656_s0 = smov 64   ;;  %s657_s18 = smov 4  }
  0x32   :  { %43 = dma.hbm_to_vmem [thread:$0]  %s780_s2, 2048, %s38_s13, [#allocation6], %s656_s0, %s656_s0, %s657_s18  }
  0x33   :  { %647 = dma.done.wait [#allocation3], 256  }
  0x34   :  { %648 = vsyncadd [#allocation3], 4294967040 }
  0x35   :  { %649 = dma.done.wait [#allocation6], 2304  }
  0x36   :  { %650 = vsyncadd [#allocation6], 4294964992  ;;  %v540_v0 = vld [vmem:[#allocation7 + $0x40] sm:$0xff]   ;;  %v542_v2 = vld [vmem:[#allocation7 + $0x48] sm:$0xff]   ;;  %v658_v6 = vmov 1966171168   ;;  %v67_v8 = vlaneseq }
  0x37   :  { %v541_v1 = vld [vmem:[#allocation7] sm:$0xff]   ;;  %475 = vmatprep.subr.bf16.mxu0 %v540_v0  ;;  %515 = vmatprep.subr.bf16.mxu1 %v540_v0  ;;  %v543_v3 = vld [vmem:[#allocation7 + $0x8] sm:$0xff]   ;;  %v544_v4 = vld [vmem:[#allocation7 + $0x50] sm:$0xff]   ;;  %v65_v7 = vunpack.c.l.s4 %v658_v6 }
  0x38   :  { %476 = vmatpush3.bf16.msra.mxu0 %v541_v1  ;;  %523 = vmatpush3.bf16.msra.mxu1 %v541_v1  ;;  %v545_v5 = vld [vmem:[#allocation7 + $0x10] sm:$0xff]   ;;  %v546_v9 = vld [vmem:[#allocation7 + $0x58] sm:$0xff]   ;;  %v68_v12 = vshrl.u32 %v67_v8, 7  ;;  %v548_v13 = vld [vmem:[#allocation7 + $0x60] sm:$0xff]  }
  0x39   :  { %477 = vmatprep.subr.bf16.mxu0 %v542_v2  ;;  %516 = vmatprep.subr.bf16.mxu1 %v542_v2  ;;  %v547_v10 = vld [vmem:[#allocation7 + $0x18] sm:$0xff]   ;;  %v66_v11 = vunpack.c.0.s8 %v65_v7  ;;  %v549_v14 = vld [vmem:[#allocation7 + $0x20] sm:$0xff]   ;;  %v550_v16 = vld [vmem:[#allocation7 + $0x68] sm:$0xff]  }
  0x3a   :  { %v556_v17 = vld [vmem:[#allocation2] ss:$8 sps:$4 sm:$0xff]   ;;  %v558_v18 = vld [vmem:[#allocation2 + $0x4] ss:$8 sps:$4 sm:$0xff]   ;;  %v723_v21 = vsub.s32 1, %v68_v12  ;;  %v552_v23 = vld [vmem:[#allocation7 + $0x70] sm:$0xff]  }
  0x3b   :  { %v69_v15 = vsub.s32 %v66_v11, %v68_v12  ;;  %v551_v19 = vld [vmem:[#allocation7 + $0x28] sm:$0xff]   ;;  %v725_v24 = vsub.s32 0, %v68_v12  ;;  %v727_v29 = vld [vmem:[#allocation5 + $0x8] sm:$0xff]  ;;  %v553_v30 = vld [vmem:[#allocation7 + $0x30] sm:$0xff]  }
  0x3c   :  { %478 = vmatpush3.bf16.msra.mxu0 %v543_v3  ;;  %524 = vmatpush3.bf16.msra.mxu1 %v543_v3  ;;  %v730_v34 = vld [vmem:[#allocation5] sm:$0xff]  ;;  %v554_v35 = vld [vmem:[#allocation7 + $0x78] sm:$0xff]  }
  0x3d   :  { %479 = vmatprep.subr.bf16.mxu0 %v544_v4  ;;  %517 = vmatprep.subr.bf16.mxu1 %v544_v4  ;;  %v70_v20 = vrot.slane %v556_v17, %v69_v15  ;;  %v77_v22 = vrot.slane %v558_v18, %v69_v15  ;;  %v555_v47 = vld [vmem:[#allocation7 + $0x38] sm:$0xff]  }
  0x3f   :  { %v78_v25 = vcombine.high %v70_v20, %v70_v20  ;;  %v86_v26 = vrot.slane %v70_v20, %v69_v15  ;;  %v79_v27 = vcombine.high %v77_v22, %v77_v22  ;;  %v93_v28 = vrot.slane %v77_v22, %v69_v15 }
  0x40   :  { %480 = vmatpush3.bf16.msra.mxu0 %v545_v5  ;;  %525 = vmatpush3.bf16.msra.mxu1 %v545_v5 }
  0x41   :  { %481 = vmatprep.subr.bf16.mxu0 %v546_v9  ;;  %518 = vmatprep.subr.bf16.mxu1 %v546_v9  ;;  %v100_v31 = vrot.slane %v78_v25, %v69_v15  ;;  %v119_v32 = vrot.slane %v86_v26, %v723_v21  ;;  %v107_v33 = vrot.slane %v79_v27, %v69_v15 }
  0x42   :  { %v151_v36 = vrot.slane %v93_v28, %v723_v21  ;;  %v115_v37 = vrot.slane %v86_v26, %v725_v24  ;;  %v147_v38 = vrot.slane %v93_v28, %v725_v24  ;;  %v108_v59 = vcombine.high %v86_v26, %v86_v26 }
  0x43   :  { %v127_v39 = vrot.slane %v100_v31, %v723_v21  ;;  %v193_v40 = vsub.f32 %v119_v32, %v727_v29  ;;  %v159_v41 = vrot.slane %v107_v33, %v723_v21  ;;  %v123_v42 = vrot.slane %v100_v31, %v725_v24 }
  0x44   :  { %482 = vmatpush3.bf16.msra.mxu0 %v547_v10  ;;  %526 = vmatpush3.bf16.msra.mxu1 %v547_v10  ;;  %v201_v43 = vsub.f32 %v151_v36, %v727_v29  ;;  %v192_v44 = vsub.f32 %v115_v37, %v730_v34  ;;  %v155_v45 = vrot.slane %v107_v33, %v725_v24 }
  0x45   :  { %483 = vmatprep.subr.bf16.mxu0 %v548_v13  ;;  %519 = vmatprep.subr.bf16.mxu1 %v548_v13  ;;  %v200_v46 = vsub.f32 %v147_v38, %v730_v34  ;;  %v195_v48 = vsub.f32 %v127_v39, %v727_v29  ;;  %v209_v49 = vmul.f32 %v193_v40, %v193_v40 }
  0x46   :  { %v203_v50 = vsub.f32 %v159_v41, %v727_v29  ;;  %v217_v51 = vmul.f32 %v201_v43, %v201_v43  ;;  %v194_v52 = vsub.f32 %v123_v42, %v730_v34  ;;  %v208_v53 = vmul.f32 %v192_v44, %v192_v44 }
  0x47   :  { %v211_v54 = vmul.f32 %v195_v48, %v195_v48  ;;  %v202_v56 = vsub.f32 %v155_v45, %v730_v34  ;;  %v216_v57 = vmul.f32 %v200_v46, %v200_v46  ;;  %v110_v60 = vcombine.high %v100_v31, %v100_v31 }
  0x48   :  { %484 = vmatpush3.bf16.msra.mxu0 %v549_v14  ;;  %527 = vmatpush3.bf16.msra.mxu1 %v549_v14  ;;  %v219_v55 = vmul.f32 %v203_v50, %v203_v50  ;;  %v210_v58 = vmul.f32 %v194_v52, %v194_v52  ;;  %v109_v61 = vcombine.high %v93_v28, %v93_v28 }
  0x49   :  { %485 = vmatprep.subr.bf16.mxu0 %v550_v16  ;;  %520 = vmatprep.subr.bf16.mxu1 %v550_v16  ;;  %v225_v62 = vpack.c.bf16 %v211_v54, %v209_v49  ;;  %v218_v0 = vmul.f32 %v202_v56, %v202_v56  ;;  %v135_v2 = vrot.slane %v108_v59, %v723_v21 }
  0x4a   :  { %v229_v63 = vpack.c.bf16 %v219_v55, %v217_v51  ;;  %v224_v1 = vpack.c.bf16 %v210_v58, %v208_v53  ;;  %v143_v3 = vrot.slane %v110_v60, %v723_v21  ;;  %v111_v4 = vcombine.high %v107_v33, %v107_v33 }
  0x4b   :  { %399 = vmatprep.mubr.bf16.mxu0 %v225_v62  ;;  %v228_v5 = vpack.c.bf16 %v218_v0, %v216_v57  ;;  %v167_v6 = vrot.slane %v109_v61, %v723_v21  ;;  %v131_v7 = vrot.slane %v108_v59, %v725_v24  ;;  %v197_v8 = vsub.f32 %v135_v2, %v727_v29 }
  0x4c   :  { %486 = vmatpush3.bf16.msra.mxu0 %v551_v19  ;;  %528 = vmatpush3.bf16.msra.mxu1 %v551_v19  ;;  %v199_v9 = vsub.f32 %v143_v3, %v727_v29  ;;  %v175_v10 = vrot.slane %v111_v4, %v723_v21  ;;  %v139_v11 = vrot.slane %v110_v60, %v725_v24 }
  0x4d   :  { %487 = vmatprep.subr.bf16.mxu0 %v552_v23  ;;  %521 = vmatprep.subr.bf16.mxu1 %v552_v23  ;;  %v205_v12 = vsub.f32 %v167_v6, %v727_v29  ;;  %v196_v13 = vsub.f32 %v131_v7, %v730_v34  ;;  %v163_v14 = vrot.slane %v109_v61, %v725_v24 }
  0x4e   :  { %415 = vmatprep.mubr.bf16.mxu1 %v229_v63  ;;  %v171_v15 = vrot.slane %v111_v4, %v725_v24  ;;  %v213_v16 = vmul.f32 %v197_v8, %v197_v8  ;;  %v215_v17 = vmul.f32 %v199_v9, %v199_v9  ;;  %v207_v18 = vsub.f32 %v175_v10, %v727_v29 }
  0x4f   :  { %v198_v19 = vsub.f32 %v139_v11, %v730_v34  ;;  %v221_v20 = vmul.f32 %v205_v12, %v205_v12  ;;  %v212_v22 = vmul.f32 %v196_v13, %v196_v13  ;;  %v204_v21 = vsub.f32 %v163_v14, %v730_v34 }
  0x50   :  { %488 = vmatpush3.bf16.msra.mxu0 %v553_v30  ;;  %529 = vmatpush3.bf16.msra.mxu1 %v553_v30  ;;  %v206_v23 = vsub.f32 %v171_v15, %v730_v34  ;;  %v227_v25 = vpack.c.bf16 %v215_v17, %v213_v16  ;;  %v223_v26 = vmul.f32 %v207_v18, %v207_v18 }
  0x51   :  { %489 = vmatprep.subr.bf16.mxu0 %v554_v35  ;;  %522 = vmatprep.subr.bf16.mxu1 %v554_v35  ;;  %v214_v27 = vmul.f32 %v198_v19, %v198_v19  ;;  %v220_v28 = vmul.f32 %v204_v21, %v204_v21  ;;  %v458_v35 = vld [vmem:[%s781_s3] ss:$0 sm:$0xff]  ;;  %s659_s3 = smov [#allocation8]  }
  0x52   :  { %v222_v30 = vmul.f32 %v206_v23, %v206_v23  ;;  %v231_v31 = vpack.c.bf16 %v223_v26, %v221_v20  ;;  %s445_s26 = sshll.u32 %s659_s3, 4  ;;  %s446_s26 = int_to_ptr.vmem [resolvable:$true] %s445_s26 }
  0x53   :  { %v226_v24 = vpack.c.bf16 %v214_v27, %v212_v22  ;;  %s625_s27 = scalar_lea.vmem %s446_s26, 1024  ;;  %p630_p11 = scmp.lt.s32.totalorder %s446_s26, %s446_s26 }
  0x54   :  { %490 = vmatpush3.bf16.msra.mxu0 %v555_v47  ;;  %530 = vmatpush3.bf16.msra.mxu1 %v555_v47  ;;  %v230_v32 = vpack.c.bf16 %v222_v30, %v220_v28  ;;  %p626_p10 = scmp.ne.s32.totalorder %s446_s26, %s625_s27  ;;  %p631_p12 = scmp.lt.s32.totalorder %s625_s27, %s625_s27 }
  0x56   :  { %p632_p13 = por %p631_p12, %p630_p11 }
  0x57   :  { %400 = vmatmul.mubr.bf16.vlgmr.msra.gmra.mrb[0].mxu0 %v224_v1  ;;  %416 = vmatmul.mubr.bf16.vlgmr.msra.gmra.mrb[0].mxu1 %v228_v5 }
  0x58   :  { %407 = vmatprep.mubr.bf16.mxu0 %v227_v25  ;;  %423 = vmatprep.mubr.bf16.mxu1 %v231_v31  ;;  %p633_p0 = pnand %p632_p13, %p626_p10 }
  0x5f   :  { %408 = vmatmul.mubr.bf16.gmra.mrb[4].mxu0 %v226_v24  ;;  %424 = vmatmul.mubr.bf16.gmra.mrb[4].mxu1 %v230_v32 }
 0x12a   :  { %v491_v29 = vpop.f32.mrb[0].mxu0  ;;  %v503_v33 = vpop.f32.mrb[0].mxu1 }
 0x12b   :  { %v492_v36 = vpop.f32.mrb[1].mxu0  ;;  %v504_v37 = vpop.f32.mrb[1].mxu1 }
 0x12c   :  { %v493_v34 = vadd.f32 %v492_v36, %v491_v29  ;;  %v494_v38 = vpop.f32.mrb[2].mxu0  ;;  %v505_v39 = vadd.f32 %v504_v37, %v503_v33  ;;  %v506_v40 = vpop.f32.mrb[2].mxu1 }
 0x12d   :  { %v495_v41 = vpop.f32.mrb[3].mxu0  ;;  %v507_v44 = vpop.f32.mrb[3].mxu1 }
 0x12e   :  { %v402_v42 = vadd.f32 %v493_v34, %v458_v35  ;;  %v496_v43 = vadd.f32 %v495_v41, %v494_v38  ;;  %v418_v45 = vadd.f32 %v505_v39, %v458_v35  ;;  %v508_v46 = vadd.f32 %v507_v44, %v506_v40 }
 0x130   :  { %432 = vst [vmem:[#allocation8] sm:$0xff] %v402_v42  ;;  %v405_v47 = vadd.f32 %v496_v43, %v458_v35  ;;  %436 = vst [vmem:[#allocation8 + $0x20] sm:$0xff] %v418_v45  ;;  %v421_v48 = vadd.f32 %v508_v46, %v458_v35 }
 0x132   :  { %433 = vst [vmem:[#allocation8 + $0x8] sm:$0xff] %v405_v47  ;;  %v497_v49 = vpop.f32.mrb[4].mxu0  ;;  %437 = vst [vmem:[#allocation8 + $0x28] sm:$0xff] %v421_v48  ;;  %v509_v50 = vpop.f32.mrb[4].mxu1 }
 0x133   :  { %v498_v51 = vpop.f32.mrb[5].mxu0  ;;  %v510_v53 = vpop.f32.mrb[5].mxu1 }
 0x134   :  { %v499_v52 = vadd.f32 %v498_v51, %v497_v49  ;;  %v500_v54 = vpop.f32.mrb[6].mxu0  ;;  %v511_v55 = vadd.f32 %v510_v53, %v509_v50  ;;  %v512_v56 = vpop.f32.mrb[6].mxu1 }
 0x135   :  { %v501_v57 = vpop.f32.mrb[7].mxu0  ;;  %v513_v60 = vpop.f32.mrb[7].mxu1 }
 0x136   :  { %v410_v58 = vadd.f32 %v499_v52, %v458_v35  ;;  %v502_v59 = vadd.f32 %v501_v57, %v500_v54  ;;  %v426_v61 = vadd.f32 %v511_v55, %v458_v35  ;;  %v514_v62 = vadd.f32 %v513_v60, %v512_v56 }
 0x138   :  { %434 = vst [vmem:[#allocation8 + $0x10] sm:$0xff] %v410_v58  ;;  %v413_v63 = vadd.f32 %v502_v59, %v458_v35  ;;  %438 = vst [vmem:[#allocation8 + $0x30] sm:$0xff] %v426_v61  ;;  %v429_v0 = vadd.f32 %v514_v62, %v458_v35 }
 0x13a   :  { %435 = vst [vmem:[#allocation8 + $0x18] sm:$0xff] %v413_v63  ;;  %439 = vst [vmem:[#allocation8 + $0x38] sm:$0xff] %v429_v0 }
 0x13b   :  { %636 = shalt.err (!%p633_p0)
}
 0x13c   :  { %s637_s30 = scalar_lea.hbm %s782_s4, 1024 }
 0x13d   :  { %p638_p1 = scmp.ne.s32.totalorder %s782_s4, %s637_s30  ;;  %p641_p2 = scmp.lt.u32.totalorder %s637_s30, %s782_s4 }
 0x13f   :  { %p643_p3 = pnand %p641_p2, %p638_p1 }
 0x141   :  { %646 = shalt.err (!%p643_p3)
}
 0x142   :  { %s660_s9 = smov 128   ;;  %s661_s10 = smov 8  }
 0x143   :  { %451 = dma.vmem_to_hbm [thread:$0]  %s446_s26, 1024, %s782_s4, [#allocation4], %s660_s9, %s660_s9, %s661_s10  }
 0x144   :  { %651 = dma.done.wait [#allocation4], 1024  }
 0x145   :  { %652 = vsyncadd [#allocation4], 4294966272 }
 0x146   :  { %455 = vsyncpa [#allocation3], 1 }
 0x147   :  { %456 = vsyncpa [#allocation6], 1 }
 0x148   :  { %457 = vsyncpa [#allocation4], 1 }

</bundles_post_ra>
